<compile_context>
chip_gen: v7x
topology: tpu7x:2x2x1
jax: 0.10.0
libtpu: 0.0.40
codegen_flags: <defaults>
</compile_context>

<pallas_src>
import functools

import jax
import jax.numpy as jnp
from jax import lax
from jax.experimental import pallas as pl
from jax.experimental.pallas import tpu as pltpu


def _round_up(x: int, m: int) -> int:
    return pl.cdiv(x, m) * m


def _dense_kernel(x_ref, w_ref, b_ref, o_ref, acc_ref):
    """One (tm, tn) output tile; K is the innermost ("arbitrary") grid axis.

    x_ref: [tm, tk]   activations
    w_ref: [tn, tk]   weight kept in PyTorch [D_out, D_in] layout
    b_ref: [1,  tn]   bias
    o_ref: [tm, tn]   output tile
    acc_ref: f32 VMEM accumulator, resident across the K axis.
    """
    k = pl.program_id(2)

    @pl.when(k == 0)
    def _init():
        acc_ref[...] = jnp.zeros_like(acc_ref)

    # Contract the K (lane) dim of both operands on the MXU: [tm,tk]x[tn,tk]->[tm,tn].
    acc_ref[...] += lax.dot_general(
        x_ref[...], w_ref[...],
        dimension_numbers=(((1,), (1,)), ((), ())),
        preferred_element_type=jnp.float32)

    @pl.when(k == pl.num_programs(2) - 1)
    def _finalize():
        # Bias added once, in f32 (no per-K re-broadcast; f32 VPU math for v5e).
        o_ref[...] = (acc_ref[...] + b_ref[...].astype(jnp.float32)).astype(o_ref.dtype)


@functools.partial(jax.jit, static_argnames=("tm", "tn", "tk"))
def feature_map_dense(x, weight, bias, *, tm=256, tn=256, tk=1024):
    """x: [B, D_in], weight: [D_out, D_in] (PyTorch layout), bias: [D_out].

    Returns [B, D_out, 1, 1] matching FeatureMapDense.forward (complex_valued=False).
    """
    B, D_in = x.shape
    D_out = weight.shape[0]

    # Shrink tiles to the (aligned) problem size when it is small.
    tm = min(tm, _round_up(B, 8))        # sublane multiple of 8
    tn = min(tn, _round_up(D_out, 128))  # lane-dense output (>=128 lanes)
    tk = min(tk, _round_up(D_in, 128))

    Bp = _round_up(B, tm)
    Np = _round_up(D_out, tn)
    Kp = _round_up(D_in, tk)

    # Zero-pad to tile multiples (zeros contribute nothing to the matmul;
    # padded output columns/rows are sliced off below).
    xp = x if (Bp == B and Kp == D_in) else jnp.pad(x, ((0, Bp - B), (0, Kp - D_in)))
    wp = weight if (Np == D_out and Kp == D_in) else jnp.pad(
        weight, ((0, Np - D_out), (0, Kp - D_in)))
    bp = bias if Np == D_out else jnp.pad(bias, (0, Np - D_out))
    b2d = bp.reshape(1, Np)

    grid = (Bp // tm, Np // tn, Kp // tk)

    y = pl.pallas_call(
        _dense_kernel,
        out_shape=jax.ShapeDtypeStruct((Bp, Np), x.dtype),
        grid_spec=pltpu.PrefetchScalarGridSpec(
            num_scalar_prefetch=0,
            grid=grid,
            in_specs=[
                pl.BlockSpec((tm, tk), lambda i, j, k: (i, k)),   # x  [B, D_in]
                pl.BlockSpec((tn, tk), lambda i, j, k: (j, k)),   # w  [D_out, D_in]
                pl.BlockSpec((1, tn), lambda i, j, k: (0, j)),    # bias
            ],
            out_specs=pl.BlockSpec((tm, tn), lambda i, j, k: (i, j)),
            scratch_shapes=[pltpu.VMEM((tm, tn), jnp.float32)],
        ),
        compiler_params=pltpu.CompilerParams(
            dimension_semantics=("parallel", "parallel", "arbitrary")),
    )(xp, wp, b2d)

    # Strip padding, then reshape to a [B, C, 1, 1] feature map.
    y = y[:B, :D_out]
    return y[:, :, None, None]


if __name__ == "__main__":
    key = jax.random.PRNGKey(0)
    kx, kw, kb = jax.random.split(key, 3)

    B, input_dim, output_dim = 2, 32, 64

    # Deterministic parameter init mimicking nn.Linear (uniform +-1/sqrt(in)).
    bound = 1.0 / jnp.sqrt(jnp.float32(input_dim))
    weight = jax.random.uniform(kw, (output_dim, input_dim), jnp.float32,
                                minval=-bound, maxval=bound)
    bias = jax.random.uniform(kb, (output_dim,), jnp.float32,
                              minval=-bound, maxval=bound)

    x = jax.random.normal(kx, (B, input_dim), jnp.float32)

    out = feature_map_dense(x, weight, bias)
    out = jax.block_until_ready(out)

    # Reference check against plain JAX.
    ref = (x @ weight.T + bias)[:, :, None, None]
    assert out.shape == (B, output_dim, 1, 1), out.shape
    assert jnp.allclose(out, ref, atol=1e-5, rtol=1e-5)

    # TODO(synk): complex_valued=True branch (two linears combined on real/imag
    # parts) not implemented; module default (complex_valued=False) is covered.

    print("KERNEL_OK")
</pallas_src>

<mosaic_0001>
module attributes {stable_mosaic.version = 11 : i64} {
  func.func @_dense_kernel(%arg0: i32, %arg1: i32, %arg2: i32, %arg3: memref<8x128xf32, #tpu.memory_space<vmem>>, %arg4: memref<128x128xf32, #tpu.memory_space<vmem>>, %arg5: memref<1x128xf32, #tpu.memory_space<vmem>>, %arg6: memref<8x128xf32, #tpu.memory_space<vmem>>, %arg7: memref<8x128xf32, #tpu.memory_space<vmem>>) attributes {dimension_semantics = [#tpu.dimension_semantics<parallel>, #tpu.dimension_semantics<parallel>, #tpu.dimension_semantics<arbitrary>], iteration_bounds = array<i64: 1, 1, 1>, scalar_prefetch = 0 : i64, scratch_operands = 1 : i64, tpu.core_type = #tpu.core_type<tc>, window_params = [{transform_indices = @transform_0, window_bounds = array<i64: 8, 128>}, {transform_indices = @transform_1, window_bounds = array<i64: 128, 128>}, {transform_indices = @transform_2, window_bounds = array<i64: 1, 128>}, {transform_indices = @transform_3, window_bounds = array<i64: 8, 128>}]} {
    %c0_i32 = arith.constant 0 : i32
    %0 = arith.cmpi eq, %arg2, %c0_i32 : i32
    %1 = arith.extui %0 : i1 to i32
    %c0_i32_0 = arith.constant 0 : i32
    %2 = arith.cmpi ne, %1, %c0_i32_0 : i32
    scf.if %2 {
      %cst_10 = arith.constant 0.000000e+00 : f32
      %12 = vector.broadcast %cst_10 : f32 to vector<8x128xf32>
      %c0_11 = arith.constant 0 : index
      %c0_12 = arith.constant 0 : index
      %13 = vector.load %arg7[%c0_11, %c0_12] : memref<8x128xf32, #tpu.memory_space<vmem>>, vector<8x128xf32>
      tpu.vector_store %arg7[%c0_11, %c0_12], %12 {strides = array<i32>} : memref<8x128xf32, #tpu.memory_space<vmem>>, vector<8x128xf32>,
    } else {
    }
    %c0 = arith.constant 0 : index
    %c0_1 = arith.constant 0 : index
    %3 = vector.load %arg7[%c0, %c0_1] : memref<8x128xf32, #tpu.memory_space<vmem>>, vector<8x128xf32>
    %c0_2 = arith.constant 0 : index
    %c0_3 = arith.constant 0 : index
    %4 = vector.load %arg3[%c0_2, %c0_3] : memref<8x128xf32, #tpu.memory_space<vmem>>, vector<8x128xf32>
    %c0_4 = arith.constant 0 : index
    %c0_5 = arith.constant 0 : index
    %5 = vector.load %arg4[%c0_4, %c0_5] : memref<128x128xf32, #tpu.memory_space<vmem>>, vector<128x128xf32>
    %cst = arith.constant dense<0.000000e+00> : vector<8x128xf32>
    %6 = tpu.matmul %4, %5, %cst {dimension_numbers = #tpu.dot_dimension_numbers<[1], [1], [0], [0], [0, 0, 1, 0], [], []>} : vector<8x128xf32>, vector<128x128xf32>, vector<8x128xf32> -> vector<8x128xf32>
    %7 = arith.addf %3, %6 : vector<8x128xf32>
    %c0_6 = arith.constant 0 : index
    %c0_7 = arith.constant 0 : index
    %8 = vector.load %arg7[%c0_6, %c0_7] : memref<8x128xf32, #tpu.memory_space<vmem>>, vector<8x128xf32>
    tpu.vector_store %arg7[%c0_6, %c0_7], %7 {strides = array<i32>} : memref<8x128xf32, #tpu.memory_space<vmem>>, vector<8x128xf32>,
    %c0_i32_8 = arith.constant 0 : i32
    %9 = arith.cmpi eq, %arg2, %c0_i32_8 : i32
    %10 = arith.extui %9 : i1 to i32
    %c0_i32_9 = arith.constant 0 : i32
    %11 = arith.cmpi ne, %10, %c0_i32_9 : i32
    scf.if %11 {
      %c0_10 = arith.constant 0 : index
      %c0_11 = arith.constant 0 : index
      %12 = vector.load %arg7[%c0_10, %c0_11] : memref<8x128xf32, #tpu.memory_space<vmem>>, vector<8x128xf32>
      %c0_12 = arith.constant 0 : index
      %c0_13 = arith.constant 0 : index
      %13 = vector.load %arg5[%c0_12, %c0_13] : memref<1x128xf32, #tpu.memory_space<vmem>>, vector<1x128xf32>
      %14 = vector.broadcast %13 : vector<1x128xf32> to vector<8x128xf32>
      %15 = arith.addf %12, %14 : vector<8x128xf32>
      %c0_14 = arith.constant 0 : index
      %c0_15 = arith.constant 0 : index
      %16 = vector.load %arg6[%c0_14, %c0_15] : memref<8x128xf32, #tpu.memory_space<vmem>>, vector<8x128xf32>
      tpu.vector_store %arg6[%c0_14, %c0_15], %15 {strides = array<i32>} : memref<8x128xf32, #tpu.memory_space<vmem>>, vector<8x128xf32>,
    } else {
    }
    return
  }
  func.func @transform_0(%arg0: i32, %arg1: i32, %arg2: i32) -> (i32, i32) {
    %c0_i32 = arith.constant 0 : i32
    return %arg0, %arg2 : i32, i32
  }
  func.func @transform_1(%arg0: i32, %arg1: i32, %arg2: i32) -> (i32, i32) {
    %c0_i32 = arith.constant 0 : i32
    return %arg1, %arg2 : i32, i32
  }
  func.func @transform_2(%arg0: i32, %arg1: i32, %arg2: i32) -> (i32, i32) {
    %c0_i32 = arith.constant 0 : i32
    %c0_i32_0 = arith.constant 0 : i32
    return %c0_i32, %arg1 : i32, i32
  }
  func.func @transform_3(%arg0: i32, %arg1: i32, %arg2: i32) -> (i32, i32) {
    %c0_i32 = arith.constant 0 : i32
    return %arg0, %arg1 : i32, i32
  }
}

</mosaic_0001>

<bundles_post_ra>
// kernel: feature_map_dense.1
= control target key start
LH: loop header
LB: loop body
LE: loop exit
PB: predicated region body
PF: predicated region fallthrough
CT: control target
= control target key end

     0   :  { %v206_v0 = vmov 0.0|0.0   ;;  %vm207_vm0 = vmmov 0   ;;  %v208_v3 = vmov 0.0   ;;  %s286_s1 = inlined_call_operand.vmem [shape: f32[128,128], index: 1, kind: input, shape index: {}]   ;;  %s287_s0 = inlined_call_operand.vmem [shape: f32[8,128], index: 0, kind: input, shape index: {}]   ;;  %s288_s2 = inlined_call_operand.vmem [shape: f32[1,128], index: 2, kind: input, shape index: {}]   ;;  %s289_s3 = inlined_call_operand.vmem [shape: f32[8,128], index: 3, kind: output, shape index: {}]  }
   0x1   :  { %179 = vmatprep.subr.bf16.mxu0 %v206_v0  ;;  %v21_v1 = vld [vmem:[%s286_s1] sm:$0xff]  ;;  %v22_v2 = vld [vmem:[%s286_s1 + $0x8] sm:$0xff]  ;;  %176 = vmatprep.mubr.msk.f32.mxu0 %vm207_vm0, %v208_v3  ;;  %v23_v5 = vld [vmem:[%s286_s1 + $0x10] sm:$0xff] }
   0x2   :  { %v180_v4 = vpack.c.bf16 %v22_v2, %v21_v1  ;;  %v24_v6 = vld [vmem:[%s286_s1 + $0x18] sm:$0xff]  ;;  %v25_v8 = vld [vmem:[%s286_s1 + $0x20] sm:$0xff]  ;;  %v26_v9 = vld [vmem:[%s286_s1 + $0x28] sm:$0xff] }
   0x3   :  { %v183_v7 = vpack.c.bf16 %v24_v6, %v23_v5  ;;  %v186_v10 = vpack.c.bf16 %v26_v9, %v25_v8  ;;  %v27_v11 = vld [vmem:[%s286_s1 + $0x30] sm:$0xff]  ;;  %v28_v12 = vld [vmem:[%s286_s1 + $0x38] sm:$0xff]  ;;  %v29_v14 = vld [vmem:[%s286_s1 + $0x40] sm:$0xff] }
   0x4   :  { %181 = vmatpush3.bf16.xpose.msra.mxu0 %v180_v4  ;;  %v189_v13 = vpack.c.bf16 %v28_v12, %v27_v11  ;;  %v30_v15 = vld [vmem:[%s286_s1 + $0x48] sm:$0xff]  ;;  %v31_v17 = vld [vmem:[%s286_s1 + $0x50] sm:$0xff]  ;;  %v32_v18 = vld [vmem:[%s286_s1 + $0x58] sm:$0xff] }
   0x5   :  { %182 = vmatprep.subr.bf16.mxu0 %v206_v0  ;;  %v192_v16 = vpack.c.bf16 %v30_v15, %v29_v14  ;;  %v195_v19 = vpack.c.bf16 %v32_v18, %v31_v17  ;;  %v33_v20 = vld [vmem:[%s286_s1 + $0x60] sm:$0xff]  ;;  %v34_v21 = vld [vmem:[%s286_s1 + $0x68] sm:$0xff]  ;;  %v35_v23 = vld [vmem:[%s286_s1 + $0x70] sm:$0xff] }
   0x6   :  { %v198_v22 = vpack.c.bf16 %v34_v21, %v33_v20  ;;  %v36_v24 = vld [vmem:[%s286_s1 + $0x78] sm:$0xff]  ;;  %v20_v26 = vld [vmem:[%s287_s0] sm:$0xff] }
   0x7   :  { %v201_v25 = vpack.c.bf16 %v36_v24, %v35_v23  ;;  %v126_v27 = vld [vmem:[%s288_s2] ss:$0 sm:$0xff] }
   0xc   :  { %184 = vmatpush3.bf16.xpose.msra.mxu0 %v183_v7 }
   0xd   :  { %185 = vmatprep.subr.bf16.mxu0 %v206_v0 }
  0x14   :  { %187 = vmatpush3.bf16.xpose.msra.mxu0 %v186_v10 }
  0x15   :  { %188 = vmatprep.subr.bf16.mxu0 %v206_v0 }
  0x1c   :  { %190 = vmatpush3.bf16.xpose.msra.mxu0 %v189_v13 }
  0x1d   :  { %191 = vmatprep.subr.bf16.mxu0 %v206_v0 }
  0x24   :  { %193 = vmatpush3.bf16.xpose.msra.mxu0 %v192_v16 }
  0x25   :  { %194 = vmatprep.subr.bf16.mxu0 %v206_v0 }
  0x2c   :  { %196 = vmatpush3.bf16.xpose.msra.mxu0 %v195_v19 }
  0x2d   :  { %197 = vmatprep.subr.bf16.mxu0 %v206_v0 }
  0x34   :  { %199 = vmatpush3.bf16.xpose.msra.mxu0 %v198_v22 }
  0x35   :  { %200 = vmatprep.subr.bf16.mxu0 %v206_v0 }
  0x3c   :  { %202 = vmatpush3.bf16.xpose.msra.mxu0 %v201_v25 }
  0x43   :  { %177 = vmatmul.mubr.f32.vlgmr.msra.gmra.mrb[0].mxu0 %v20_v26 }
 0x116   :  { %v103_v28 = vpop.f32.mrb[0].mxu0 }
 0x117   :  { %v120_v29 = vadd.f32 %v126_v27, %v103_v28  ;;  %v178_v30 = vpop.f32.mrb[1].mxu0 }
 0x119   :  { %121 = vst [vmem:[%s289_s3] sm:$0xff] %v120_v29 }

</bundles_post_ra>
